<compile_context>
chip_gen: v7x
topology: tpu7x:2x2x1
jax: 0.10.0
libtpu: 0.0.40
codegen_flags: <defaults>
</compile_context>

<pallas_src>
import jax
import jax.numpy as jnp
from jax.experimental import pallas as pl
from jax.experimental.pallas import tpu as pltpu


def _roundup(v, m):
    return (v + m - 1) // m * m


def _padded_bytes(rows, cols, itemsize):
    # (sublane, lane)-tile padded VMEM footprint estimate.
    sub = 8 * (4 // itemsize) if itemsize < 4 else 8
    return _roundup(max(rows, 1), sub) * _roundup(max(cols, 1), 128) * itemsize


# ----------------------------------------------------------------------------
# Wrapper: packs params/activations into lane-dense 128-aligned slabs, runs one
# fused Pallas kernel, unpacks the lane-dense output slab.
# ----------------------------------------------------------------------------
def gvae_forward(adj, x, params, eps):
    f32 = jnp.float32
    bf16 = jnp.bfloat16

    n, f_in = x.shape
    hidden = params["w1"].shape[1]
    latent = params["wmu"].shape[1]

    # ---- pack weights + biases into two slabs; every block 128-aligned -----
    # mu/logvar heads are fused into one block so they share one MXU matmul.
    blocks = [
        ("w1", params["w1"], params["b1"]),
        ("w2", params["w2"], params["b2"]),
        ("w3", params["w3"], params["b3"]),
        ("whead",
         jnp.concatenate([params["wmu"], params["wlv"]], axis=1),
         jnp.concatenate([params["bmu"], params["blv"]])),
        ("wd1", params["wd1"], params["bd1"]),
        ("wd2", params["wd2"], params["bd2"]),
    ]
    rmax = _roundup(max(w.shape[0] for _, w, _ in blocks), 8)

    offs = {}
    w_parts, b_parts = [], []
    off = 0
    for name, w, b in blocks:
        din, dout = w.shape
        block_cols = _roundup(dout, 128)      # 128-aligned block start offsets
        w_parts.append(jnp.pad(w, ((0, rmax - din), (0, block_cols - dout))))
        b_parts.append(jnp.pad(b.reshape(1, dout),
                               ((0, 0), (0, block_cols - dout))))
        offs[name] = (off, din, dout)
        off += block_cols
    wcols = off
    w_slab = jnp.concatenate(w_parts, axis=1).astype(bf16)   # MXU operands bf16
    b_slab = jnp.concatenate(b_parts, axis=1).astype(f32)    # biases in f32

    # ---- pack (x | eps) into one lane-dense slab; eps 128-aligned ----------
    x_cols = _roundup(f_in, 128)
    eps_off = x_cols
    xe_cols = x_cols + _roundup(latent, 128)
    xe = jnp.zeros((n, xe_cols), f32)
    xe = xe.at[:, :f_in].set(x.astype(f32))
    xe = xe.at[:, eps_off:eps_off + latent].set(eps.astype(f32))

    adj_bf16 = adj.astype(bf16)               # halves adjacency DMA/VMEM bytes

    # ---- lane-aligned packed output layout ----------------------------------
    off_s = 0
    off_dec = _roundup(n, 128)
    off_mu = off_dec + _roundup(f_in, 128)
    off_lv = off_mu + _roundup(latent, 128)
    out_cols = off_lv + _roundup(latent, 128)

    # row-chunk size for the z z^T structure decoder
    tm_s = min(_roundup(n, 8), 512)

    # ---- fused kernel --------------------------------------------------------
    def kernel(adj_ref, xe_ref, w_ref, b_ref, out_ref):
        def W(name):
            o, din, dout = offs[name]
            return w_ref[0:din, o:o + dout]        # 128-aligned static view

        def B(name):
            o, _, dout = offs[name]
            return b_ref[0:1, o:o + dout]          # (1, dout) f32 row

        def mm(a, b):
            # MXU matmul: bf16 operands, f32 accumulation.
            return jax.lax.dot_general(
                a.astype(bf16), b.astype(bf16),
                dimension_numbers=(((1,), (0,)), ((), ())),
                preferred_element_type=f32)

        def gcn(adj_v, h, name):
            # GCNConv:  Â h W + b, associated so the N^2 contraction always
            # runs against the narrower operand.
            _, din, dout = offs[name]
            w = W(name)
            bias = B(name)
            if din <= dout:
                return mm(mm(adj_v, h), w) + bias   # aggregate narrow feats first
            return mm(adj_v, mm(h, w)) + bias       # project first, then aggregate

        adj_v = adj_ref[...]                        # (N, N) bf16
        x_v = xe_ref[:, 0:f_in]                     # (N, F) f32, aligned view
        eps_v = xe_ref[:, eps_off:eps_off + latent]  # (N, L) f32, aligned view

        # --- encoder ---
        h = jnp.maximum(gcn(adj_v, x_v, "w1"), 0.0)
        h = jnp.maximum(gcn(adj_v, h, "w2"), 0.0)
        h = jax.nn.sigmoid(mm(h, W("w3")) + B("w3"))

        # --- fused variational heads: one (N,L)x(L,2L) matmul ---
        hd = mm(h, W("whead")) + B("whead")
        mu = hd[:, 0:latent]
        logvar = hd[:, latent:2 * latent]

        # --- reparameterization (f32): z = mu + exp(0.5*logvar)*eps ---
        z = mu + jnp.exp(0.5 * logvar) * eps_v
        zb = z.astype(bf16)

        # --- structure decoder: sigmoid(z z^T), row-tiled, stored directly ---
        # (last-dim contraction -> no materialized transpose; no (N,N) temp)
        for r0 in range(0, n, tm_s):
            rows = min(tm_s, n - r0)
            logits = jax.lax.dot_general(
                zb[r0:r0 + rows, :], zb,
                dimension_numbers=(((1,), (1,)), ((), ())),
                preferred_element_type=f32)
            out_ref[r0:r0 + rows, off_s:off_s + n] = jax.nn.sigmoid(logits)

        # --- attribute decoder (final Sigmoid is defined but NOT applied in
        #     the reference forward, so it is not applied here either) ---
        d = jnp.maximum(gcn(adj_v, z, "wd1"), 0.0)
        dec = gcn(adj_v, d, "wd2")

        # --- direct aligned sub-slice stores (pad lanes left unwritten) ---
        out_ref[:, off_dec:off_dec + f_in] = dec
        out_ref[:, off_mu:off_mu + latent] = mu
        out_ref[:, off_lv:off_lv + latent] = logvar

    # ---- VMEM budget: sum of actual padded buffers + headroom ---------------
    act_w = max(hidden, f_in, 2 * latent)
    est = (_padded_bytes(n, n, 2)                 # adj (bf16)
           + _padded_bytes(n, xe_cols, 4)         # x|eps slab
           + _padded_bytes(rmax, wcols, 2)        # weight slab (bf16)
           + _padded_bytes(1, wcols, 4)           # bias slab
           + _padded_bytes(n, out_cols, 4)        # packed output slab
           + _padded_bytes(tm_s, n, 4)            # one structure-decoder chunk
           + 2 * _padded_bytes(n, n, 2)           # bf16 copies feeding adj matmuls
           + 6 * _padded_bytes(n, act_w, 4)       # f32 activation temporaries
           + 4 * _padded_bytes(n, act_w, 2))      # bf16 cast temporaries
    try:
        cap = pltpu.get_tpu_info().vmem_capacity_bytes - (8 << 20)
    except Exception:
        cap = 56 << 20        # conservative: v7x physical VMEM minus headroom
    vmem_limit = int(min(cap, max(32 << 20, int(est * 1.5))))

    vmem = pl.BlockSpec(memory_space=pltpu.MemorySpace.VMEM)
    packed = pl.pallas_call(
        kernel,
        out_shape=jax.ShapeDtypeStruct((n, out_cols), f32),
        in_specs=[vmem, vmem, vmem, vmem],
        out_specs=vmem,
        compiler_params=pltpu.CompilerParams(vmem_limit_bytes=vmem_limit),
    )(adj_bf16, xe, w_slab, b_slab)

    # ---- unpack the lane-dense output slab -----------------------------------
    s = packed[:, off_s:off_s + n]
    decoded = packed[:, off_dec:off_dec + f_in]
    mu = packed[:, off_mu:off_mu + latent]
    logvar = packed[:, off_lv:off_lv + latent]
    return s, decoded, mu, logvar


# ----------------------------------------------------------------------------
# Plain-JAX glue: dense symmetric GCN normalization  Â = D^{-1/2}(A+I)D^{-1/2}
# ----------------------------------------------------------------------------
def gcn_norm_dense(edge_index, num_nodes):
    a = jnp.zeros((num_nodes, num_nodes), jnp.float32)
    a = a.at[edge_index[0], edge_index[1]].add(1.0)
    a = a + jnp.eye(num_nodes, dtype=jnp.float32)          # add self loops
    deg = a.sum(axis=1)
    dinv = jnp.where(deg > 0, 1.0 / jnp.sqrt(deg), 0.0)
    return a * dinv[:, None] * dinv[None, :]


def init_params(key, input_size, hidden_size, latent_size):
    ks = jax.random.split(key, 7)

    def glorot(k, din, dout):
        s = jnp.sqrt(2.0 / (din + dout)).astype(jnp.float32)
        return jax.random.normal(k, (din, dout), jnp.float32) * s

    return {
        "w1": glorot(ks[0], input_size, hidden_size),
        "b1": jnp.zeros((hidden_size,), jnp.float32),
        "w2": glorot(ks[1], hidden_size, latent_size),
        "b2": jnp.zeros((latent_size,), jnp.float32),
        "w3": glorot(ks[2], latent_size, latent_size),
        "b3": jnp.zeros((latent_size,), jnp.float32),
        "wmu": glorot(ks[3], latent_size, latent_size),
        "bmu": jnp.zeros((latent_size,), jnp.float32),
        "wlv": glorot(ks[4], latent_size, latent_size),
        "blv": jnp.zeros((latent_size,), jnp.float32),
        "wd1": glorot(ks[5], latent_size, hidden_size),
        "bd1": jnp.zeros((hidden_size,), jnp.float32),
        "wd2": glorot(ks[6], hidden_size, input_size),
        "bd2": jnp.zeros((input_size,), jnp.float32),
    }


if __name__ == "__main__":
    # Small shapes implied by the forward: N nodes x input_size features.
    N, INPUT, HIDDEN, LATENT = 8, 16, 32, 16

    key = jax.random.PRNGKey(0)
    k_x, k_p, k_eps = jax.random.split(key, 3)

    x = jax.random.normal(k_x, (N, INPUT), jnp.float32)

    # simple symmetric ring graph as edge_index (2, E)
    src = jnp.arange(N, dtype=jnp.int32)
    dst = (src + 1) % N
    edge_index = jnp.concatenate(
        [jnp.stack([src, dst]), jnp.stack([dst, src])], axis=1)

    adj = gcn_norm_dense(edge_index, N)
    params = init_params(k_p, INPUT, HIDDEN, LATENT)
    # torch.randn(mu.size()) equivalent — deterministic here via PRNGKey.
    eps = jax.random.normal(k_eps, (N, LATENT), jnp.float32)

    s, decoded, mu, logvar = gvae_forward(adj, x, params, eps)
    jax.block_until_ready((s, decoded, mu, logvar))

    assert s.shape == (N, N)
    assert decoded.shape == (N, INPUT)
    assert mu.shape == (N, LATENT)
    assert logvar.shape == (N, LATENT)
    print("KERNEL_OK")
</pallas_src>

<mosaic_0001>
module attributes {stable_mosaic.version = 11 : i64} {
  func.func @kernel(%arg0: memref<8x8xbf16, #tpu.memory_space<vmem>>, %arg1: memref<8x256xf32, #tpu.memory_space<vmem>>, %arg2: memref<32x768xbf16, #tpu.memory_space<vmem>>, %arg3: memref<1x768xf32, #tpu.memory_space<vmem>>, %arg4: memref<8x512xf32, #tpu.memory_space<vmem>>) attributes {dimension_semantics = [], scalar_prefetch = 0 : i64, scratch_operands = 0 : i64, tpu.core_type = #tpu.core_type<tc>} {
    %c0 = arith.constant 0 : index
    %c0_0 = arith.constant 0 : index
    %0 = vector.load %arg0[%c0, %c0_0] : memref<8x8xbf16, #tpu.memory_space<vmem>>, vector<8x8xbf16>
    %c0_1 = arith.constant 0 : index
    %c0_2 = arith.constant 0 : index
    %1 = vector.load %arg1[%c0_1, %c0_2] : memref<8x256xf32, #tpu.memory_space<vmem>>, vector<8x16xf32>
    %c0_3 = arith.constant 0 : index
    %c128 = arith.constant 128 : index
    %2 = vector.load %arg1[%c0_3, %c128] : memref<8x256xf32, #tpu.memory_space<vmem>>, vector<8x16xf32>
    %c0_4 = arith.constant 0 : index
    %c0_5 = arith.constant 0 : index
    %3 = vector.load %arg2[%c0_4, %c0_5] : memref<32x768xbf16, #tpu.memory_space<vmem>>, vector<16x32xbf16>
    %c0_6 = arith.constant 0 : index
    %c0_7 = arith.constant 0 : index
    %4 = vector.load %arg3[%c0_6, %c0_7] : memref<1x768xf32, #tpu.memory_space<vmem>>, vector<1x32xf32>
    %5 = arith.truncf %1 : vector<8x16xf32> to vector<8x16xbf16>
    %cst = arith.constant dense<0.000000e+00> : vector<8x16xf32>
    %6 = tpu.matmul %0, %5, %cst {dimension_numbers = #tpu.dot_dimension_numbers<[1], [0], [0], [1], [0, 0, 1, 1], [], []>} : vector<8x8xbf16>, vector<8x16xbf16>, vector<8x16xf32> -> vector<8x16xf32>
    %7 = arith.truncf %6 : vector<8x16xf32> to vector<8x16xbf16>
    %cst_8 = arith.constant dense<0.000000e+00> : vector<8x32xf32>
    %8 = tpu.matmul %7, %3, %cst_8 {dimension_numbers = #tpu.dot_dimension_numbers<[1], [0], [0], [1], [0, 0, 1, 1], [], []>} : vector<8x16xbf16>, vector<16x32xbf16>, vector<8x32xf32> -> vector<8x32xf32>
    %9 = vector.broadcast %4 : vector<1x32xf32> to vector<8x32xf32>
    %10 = arith.addf %8, %9 : vector<8x32xf32>
    %cst_9 = arith.constant 0.000000e+00 : f32
    %11 = vector.broadcast %cst_9 : f32 to vector<8x32xf32>
    %12 = arith.maximumf %10, %11 : vector<8x32xf32>
    %c0_10 = arith.constant 0 : index
    %c128_11 = arith.constant 128 : index
    %13 = vector.load %arg2[%c0_10, %c128_11] : memref<32x768xbf16, #tpu.memory_space<vmem>>, vector<32x16xbf16>
    %c0_12 = arith.constant 0 : index
    %c128_13 = arith.constant 128 : index
    %14 = vector.load %arg3[%c0_12, %c128_13] : memref<1x768xf32, #tpu.memory_space<vmem>>, vector<1x16xf32>
    %15 = arith.truncf %12 : vector<8x32xf32> to vector<8x32xbf16>
    %cst_14 = arith.constant dense<0.000000e+00> : vector<8x16xf32>
    %16 = tpu.matmul %15, %13, %cst_14 {dimension_numbers = #tpu.dot_dimension_numbers<[1], [0], [0], [1], [0, 0, 1, 1], [], []>} : vector<8x32xbf16>, vector<32x16xbf16>, vector<8x16xf32> -> vector<8x16xf32>
    %17 = arith.truncf %16 : vector<8x16xf32> to vector<8x16xbf16>
    %cst_15 = arith.constant dense<0.000000e+00> : vector<8x16xf32>
    %18 = tpu.matmul %0, %17, %cst_15 {dimension_numbers = #tpu.dot_dimension_numbers<[1], [0], [0], [1], [0, 0, 1, 1], [], []>} : vector<8x8xbf16>, vector<8x16xbf16>, vector<8x16xf32> -> vector<8x16xf32>
    %19 = vector.broadcast %14 : vector<1x16xf32> to vector<8x16xf32>
    %20 = arith.addf %18, %19 : vector<8x16xf32>
    %cst_16 = arith.constant 0.000000e+00 : f32
    %21 = vector.broadcast %cst_16 : f32 to vector<8x16xf32>
    %22 = arith.maximumf %20, %21 : vector<8x16xf32>
    %c0_17 = arith.constant 0 : index
    %c256 = arith.constant 256 : index
    %23 = vector.load %arg2[%c0_17, %c256] : memref<32x768xbf16, #tpu.memory_space<vmem>>, vector<16x16xbf16>
    %24 = arith.truncf %22 : vector<8x16xf32> to vector<8x16xbf16>
    %cst_18 = arith.constant dense<0.000000e+00> : vector<8x16xf32>
    %25 = tpu.matmul %24, %23, %cst_18 {dimension_numbers = #tpu.dot_dimension_numbers<[1], [0], [0], [1], [0, 0, 1, 1], [], []>} : vector<8x16xbf16>, vector<16x16xbf16>, vector<8x16xf32> -> vector<8x16xf32>
    %c0_19 = arith.constant 0 : index
    %c256_20 = arith.constant 256 : index
    %26 = vector.load %arg3[%c0_19, %c256_20] : memref<1x768xf32, #tpu.memory_space<vmem>>, vector<1x16xf32>
    %27 = vector.broadcast %26 : vector<1x16xf32> to vector<8x16xf32>
    %28 = arith.addf %25, %27 : vector<8x16xf32>
    %29 = arith.negf %28 : vector<8x16xf32>
    %30 = math.exp %29 : vector<8x16xf32>
    %cst_21 = arith.constant 1.000000e+00 : f32
    %31 = vector.broadcast %cst_21 : f32 to vector<8x16xf32>
    %32 = arith.addf %31, %30 : vector<8x16xf32>
    %33 = arith.divf %31, %32 : vector<8x16xf32>
    %c0_22 = arith.constant 0 : index
    %c384 = arith.constant 384 : index
    %34 = vector.load %arg2[%c0_22, %c384] : memref<32x768xbf16, #tpu.memory_space<vmem>>, vector<16x32xbf16>
    %35 = arith.truncf %33 : vector<8x16xf32> to vector<8x16xbf16>
    %cst_23 = arith.constant dense<0.000000e+00> : vector<8x32xf32>
    %36 = tpu.matmul %35, %34, %cst_23 {dimension_numbers = #tpu.dot_dimension_numbers<[1], [0], [0], [1], [0, 0, 1, 1], [], []>} : vector<8x16xbf16>, vector<16x32xbf16>, vector<8x32xf32> -> vector<8x32xf32>
    %c0_24 = arith.constant 0 : index
    %c384_25 = arith.constant 384 : index
    %37 = vector.load %arg3[%c0_24, %c384_25] : memref<1x768xf32, #tpu.memory_space<vmem>>, vector<1x32xf32>
    %38 = vector.broadcast %37 : vector<1x32xf32> to vector<8x32xf32>
    %39 = arith.addf %36, %38 : vector<8x32xf32>
    %40 = vector.extract_strided_slice %39 {offsets = [0, 0], sizes = [8, 16], strides = [1, 1]} : vector<8x32xf32> to vector<8x16xf32>
    %41 = vector.extract_strided_slice %39 {offsets = [0, 16], sizes = [8, 16], strides = [1, 1]} : vector<8x32xf32> to vector<8x16xf32>
    %cst_26 = arith.constant 5.000000e-01 : f32
    %42 = vector.broadcast %cst_26 : f32 to vector<8x16xf32>
    %43 = arith.mulf %42, %41 : vector<8x16xf32>
    %44 = math.exp %43 : vector<8x16xf32>
    %45 = arith.mulf %44, %2 : vector<8x16xf32>
    %46 = arith.addf %40, %45 : vector<8x16xf32>
    %47 = arith.truncf %46 : vector<8x16xf32> to vector<8x16xbf16>
    %cst_27 = arith.constant dense<0.000000e+00> : vector<8x8xf32>
    %48 = tpu.matmul %47, %47, %cst_27 {dimension_numbers = #tpu.dot_dimension_numbers<[1], [1], [0], [0], [0, 0, 1, 0], [], []>} : vector<8x16xbf16>, vector<8x16xbf16>, vector<8x8xf32> -> vector<8x8xf32>
    %49 = arith.negf %48 : vector<8x8xf32>
    %50 = math.exp %49 : vector<8x8xf32>
    %cst_28 = arith.constant 1.000000e+00 : f32
    %51 = vector.broadcast %cst_28 : f32 to vector<8x8xf32>
    %52 = arith.addf %51, %50 : vector<8x8xf32>
    %53 = arith.divf %51, %52 : vector<8x8xf32>
    %c0_29 = arith.constant 0 : index
    %c0_30 = arith.constant 0 : index
    %54 = vector.load %arg4[%c0_29, %c0_30] : memref<8x512xf32, #tpu.memory_space<vmem>>, vector<8x8xf32>
    tpu.vector_store %arg4[%c0_29, %c0_30], %53 {strides = array<i32>} : memref<8x512xf32, #tpu.memory_space<vmem>>, vector<8x8xf32>,
    %c0_31 = arith.constant 0 : index
    %c512 = arith.constant 512 : index
    %55 = vector.load %arg2[%c0_31, %c512] : memref<32x768xbf16, #tpu.memory_space<vmem>>, vector<16x32xbf16>
    %c0_32 = arith.constant 0 : index
    %c512_33 = arith.constant 512 : index
    %56 = vector.load %arg3[%c0_32, %c512_33] : memref<1x768xf32, #tpu.memory_space<vmem>>, vector<1x32xf32>
    %57 = arith.truncf %46 : vector<8x16xf32> to vector<8x16xbf16>
    %cst_34 = arith.constant dense<0.000000e+00> : vector<8x16xf32>
    %58 = tpu.matmul %0, %57, %cst_34 {dimension_numbers = #tpu.dot_dimension_numbers<[1], [0], [0], [1], [0, 0, 1, 1], [], []>} : vector<8x8xbf16>, vector<8x16xbf16>, vector<8x16xf32> -> vector<8x16xf32>
    %59 = arith.truncf %58 : vector<8x16xf32> to vector<8x16xbf16>
    %cst_35 = arith.constant dense<0.000000e+00> : vector<8x32xf32>
    %60 = tpu.matmul %59, %55, %cst_35 {dimension_numbers = #tpu.dot_dimension_numbers<[1], [0], [0], [1], [0, 0, 1, 1], [], []>} : vector<8x16xbf16>, vector<16x32xbf16>, vector<8x32xf32> -> vector<8x32xf32>
    %61 = vector.broadcast %56 : vector<1x32xf32> to vector<8x32xf32>
    %62 = arith.addf %60, %61 : vector<8x32xf32>
    %cst_36 = arith.constant 0.000000e+00 : f32
    %63 = vector.broadcast %cst_36 : f32 to vector<8x32xf32>
    %64 = arith.maximumf %62, %63 : vector<8x32xf32>
    %c0_37 = arith.constant 0 : index
    %c640 = arith.constant 640 : index
    %65 = vector.load %arg2[%c0_37, %c640] : memref<32x768xbf16, #tpu.memory_space<vmem>>, vector<32x16xbf16>
    %c0_38 = arith.constant 0 : index
    %c640_39 = arith.constant 640 : index
    %66 = vector.load %arg3[%c0_38, %c640_39] : memref<1x768xf32, #tpu.memory_space<vmem>>, vector<1x16xf32>
    %67 = arith.truncf %64 : vector<8x32xf32> to vector<8x32xbf16>
    %cst_40 = arith.constant dense<0.000000e+00> : vector<8x16xf32>
    %68 = tpu.matmul %67, %65, %cst_40 {dimension_numbers = #tpu.dot_dimension_numbers<[1], [0], [0], [1], [0, 0, 1, 1], [], []>} : vector<8x32xbf16>, vector<32x16xbf16>, vector<8x16xf32> -> vector<8x16xf32>
    %69 = arith.truncf %68 : vector<8x16xf32> to vector<8x16xbf16>
    %cst_41 = arith.constant dense<0.000000e+00> : vector<8x16xf32>
    %70 = tpu.matmul %0, %69, %cst_41 {dimension_numbers = #tpu.dot_dimension_numbers<[1], [0], [0], [1], [0, 0, 1, 1], [], []>} : vector<8x8xbf16>, vector<8x16xbf16>, vector<8x16xf32> -> vector<8x16xf32>
    %71 = vector.broadcast %66 : vector<1x16xf32> to vector<8x16xf32>
    %72 = arith.addf %70, %71 : vector<8x16xf32>
    %c0_42 = arith.constant 0 : index
    %c128_43 = arith.constant 128 : index
    %73 = vector.load %arg4[%c0_42, %c128_43] : memref<8x512xf32, #tpu.memory_space<vmem>>, vector<8x16xf32>
    tpu.vector_store %arg4[%c0_42, %c128_43], %72 {strides = array<i32>} : memref<8x512xf32, #tpu.memory_space<vmem>>, vector<8x16xf32>,
    %c0_44 = arith.constant 0 : index
    %c256_45 = arith.constant 256 : index
    %74 = vector.load %arg4[%c0_44, %c256_45] : memref<8x512xf32, #tpu.memory_space<vmem>>, vector<8x16xf32>
    tpu.vector_store %arg4[%c0_44, %c256_45], %40 {strides = array<i32>} : memref<8x512xf32, #tpu.memory_space<vmem>>, vector<8x16xf32>,
    %c0_46 = arith.constant 0 : index
    %c384_47 = arith.constant 384 : index
    %75 = vector.load %arg4[%c0_46, %c384_47] : memref<8x512xf32, #tpu.memory_space<vmem>>, vector<8x16xf32>
    tpu.vector_store %arg4[%c0_46, %c384_47], %41 {strides = array<i32>} : memref<8x512xf32, #tpu.memory_space<vmem>>, vector<8x16xf32>,
    return
  }
}

</mosaic_0001>

<bundles_post_ra>
// kernel: tpu_custom_call.1
= control target key start
LH: loop header
LB: loop body
LE: loop exit
PB: predicated region body
PF: predicated region fallthrough
CT: control target
= control target key end

     0   :  { %9 = vsyncpa [#allocation3], 0  ;;  %s1111_s0 = inlined_call_operand.hbm [shape: bf16[8,8], index: 0, kind: input, shape index: {}]   ;;  %s1112_s1 = inlined_call_operand.hbm [shape: f32[8,256], index: 1, kind: input, shape index: {}]   ;;  %s1113_s2 = inlined_call_operand.hbm [shape: bf16[32,768], index: 2, kind: input, shape index: {}]   ;;  %s1114_s3 = inlined_call_operand.vmem [shape: f32[1,768], index: 3, kind: input, shape index: {}]   ;;  %s1115_s4 = inlined_call_operand.hbm [shape: f32[8,512], index: 4, kind: output, shape index: {}]  }
   0x1   :  { %10 = vsyncpa [#allocation6], 0 }
   0x2   :  { %11 = vsyncpa [#allocation4], 0  ;;  %s949_s15 = smov [#allocation5]   ;;  %s950_s17 = smov [#allocation2]  }
   0x3   :  { %s28_s16 = sshll.u32 %s949_s15, 4  ;;  %s18_s18 = sshll.u32 %s950_s17, 4  ;;  %s29_s16 = int_to_ptr.vmem [resolvable:$true] %s28_s16  ;;  %s19_s18 = int_to_ptr.vmem [resolvable:$true] %s18_s18 }
   0x4   :  { %s855_s21 = scalar_lea.hbm %s1112_s1, 256 }
   0x5   :  { %p856_p0 = scmp.ne.s32.totalorder %s1112_s1, %s855_s21  ;;  %p859_p1 = scmp.lt.u32.totalorder %s855_s21, %s1112_s1 }
   0x7   :  { %p861_p2 = pnand %p859_p1, %p856_p0 }
   0x9   :  { %864 = shalt.err (!%p861_p2)
}
   0xa   :  { %s865_s26 = scalar_lea.vmem %s29_s16, 256  ;;  %p870_p4 = scmp.lt.s32.totalorder %s29_s16, %s29_s16 }
   0xb   :  { %p866_p3 = scmp.ne.s32.totalorder %s29_s16, %s865_s26  ;;  %p871_p5 = scmp.lt.s32.totalorder %s865_s26, %s865_s26 }
   0xd   :  { %p872_p6 = por %p871_p5, %p870_p4 }
   0xf   :  { %p873_p7 = pnand %p872_p6, %p866_p3 }
  0x11   :  { %876 = shalt.err (!%p873_p7)
}
  0x12   :  { %31 = dma.hbm_to_vmem [thread:$0]  %s1112_s1, 256, %s29_s16, [#allocation6]  }
  0x13   :  { %s877_s5 = scalar_lea.hbm %s1111_s0, 64 }
  0x14   :  { %p878_p8 = scmp.ne.s32.totalorder %s1111_s0, %s877_s5  ;;  %p881_p9 = scmp.lt.u32.totalorder %s877_s5, %s1111_s0 }
  0x16   :  { %p883_p10 = pnand %p881_p9, %p878_p8 }
  0x18   :  { %886 = shalt.err (!%p883_p10)
}
  0x19   :  { %s887_s10 = scalar_lea.vmem %s19_s18, 64  ;;  %p892_p12 = scmp.lt.s32.totalorder %s19_s18, %s19_s18 }
  0x1a   :  { %p888_p11 = scmp.ne.s32.totalorder %s19_s18, %s887_s10  ;;  %p893_p13 = scmp.lt.s32.totalorder %s887_s10, %s887_s10 }
  0x1c   :  { %p894_p0 = por %p893_p13, %p892_p12 }
  0x1e   :  { %p895_p1 = pnand %p894_p0, %p888_p11 }
  0x20   :  { %898 = shalt.err (!%p895_p1)
}
  0x21   :  { %21 = dma.hbm_to_vmem [thread:$0]  %s1111_s0, 64, %s19_s18, [#allocation3]  }
  0x22   :  { %s951_s12 = smov [#allocation7]   ;;  %s899_s16 = scalar_lea.hbm %s1113_s2, 1536 }
  0x23   :  { %s37_s13 = sshll.u32 %s951_s12, 4  ;;  %p900_p2 = scmp.ne.s32.totalorder %s1113_s2, %s899_s16  ;;  %s38_s13 = int_to_ptr.vmem [resolvable:$true] %s37_s13 }
  0x24   :  { %p903_p3 = scmp.lt.u32.totalorder %s899_s16, %s1113_s2 }
  0x26   :  { %p905_p4 = pnand %p903_p3, %p900_p2 }
  0x28   :  { %908 = shalt.err (!%p905_p4)
}
  0x29   :  { %s909_s22 = scalar_lea.vmem %s38_s13, 1536  ;;  %p914_p6 = scmp.lt.s32.totalorder %s38_s13, %s38_s13 }
  0x2a   :  { %p910_p5 = scmp.ne.s32.totalorder %s38_s13, %s909_s22  ;;  %p915_p7 = scmp.lt.s32.totalorder %s909_s22, %s909_s22 }
  0x2c   :  { %p916_p8 = por %p915_p7, %p914_p6 }
  0x2e   :  { %p917_p9 = pnand %p916_p8, %p910_p5 }
  0x30   :  { %920 = shalt.err (!%p917_p9)
}
  0x31   :  { %s952_s0 = smov 384   ;;  %s953_s18 = smov 24  }
  0x32   :  { %43 = dma.hbm_to_vmem [thread:$0]  %s1113_s2, 1536, %s38_s13, [#allocation6], %s952_s0, %s952_s0, %s953_s18  }
  0x33   :  { %943 = dma.done.wait [#allocation3], 64  }
  0x34   :  { %944 = vsyncadd [#allocation3], 4294967232 }
  0x35   :  { %945 = dma.done.wait [#allocation6], 1792  }
  0x36   :  { %946 = vsyncadd [#allocation6], 4294965504  ;;  %v954_v0 = vmov 0.0   ;;  %vm955_vm0 = vmmov 0   ;;  %v57_v1 = vld [vmem:[#allocation5] sm:$0xff]  ;;  %vm67_vm1 = vcmask 1043456  }
  0x37   :  { %757 = vmatprep.subr.bf16.mxu0 %v954_v0  ;;  %759 = vmatprep.mubr.msk.bf16.mxu0 %vm955_vm0, %v954_v0  ;;  %v62_v2 = vpack.c.bf16 %v57_v1, %v57_v1  ;;  %v1026_v3 = vld [vmem:[#allocation2] sm:$0xf]  ;;  %vm63_vm2 = vcmask 64512   ;;  %v837_v5 = vld [vmem:[#allocation7] ss:$24 sps:$4 sm:$0xff]   ;;  %vm124_vm3 = vcmask 130048  }
  0x38   :  { %763 = vmatprep.subr.bf16.mxu1 %v954_v0  ;;  %765 = vmatprep.mubr.msk.bf16.mxu1 %vm955_vm0, %v954_v0  ;;  %v838_v11 = vld [vmem:[#allocation7 + $0x4] ss:$24 sps:$4 sm:$0xff]   ;;  %v839_v12 = vld [vmem:[#allocation7 + $0x34] ss:$24 sps:$4 sm:$0xff]   ;;  %vm187_vm4 = vcmask 261120   ;;  %s956_s28 = smov 16  }
  0x39   :  { %v69_v4 = vsel %vm67_vm1, %v62_v2, 0  ;;  %764 = vmatpush3.bf16.msra.mxu1 %v837_v5  ;;  %v707_v13 = vld [vmem:[%s1114_s3] ss:$0 sm:$0xff]  ;;  %v840_v27 = vld [vmem:[#allocation7 + $0x8] ss:$24 sps:$4 sm:$0xff]   ;;  %v58_v37 = vld [vmem:[#allocation5 + $0x8] sm:$0xff] }
  0x3a   :  { %758 = vmatpush3.bf16.msra.mxu0 %v69_v4  ;;  %777 = vmatprep.subr.bf16.mxu1 %v954_v0  ;;  %v713_v28 = vld [vmem:[%s1114_s3 + $0x1] ss:$0 sm:$0xff]  ;;  %v715_v38 = vld [vmem:[%s1114_s3 + $0x2] ss:$0 sm:$0xff]  ;;  %v719_v49 = vld [vmem:[%s1114_s3 + $0x3] ss:$0 sm:$0xff] }
  0x3b   :  { %769 = vmatprep.subr.bf16.mxu0 %v954_v0  ;;  %v841_v36 = vld [vmem:[#allocation7 + $0xc] ss:$24 sps:$4 sm:$0xff]   ;;  %410 = vrot.lane.b32.xlu0 %v58_v37, %s956_s28  ;;  %s957_s7 = smov 112   ;;  %v842_v4 = vld [vmem:[#allocation7 + $0x10] ss:$24 sps:$4 sm:$0xff]   ;;  %s958_s11 = smov [#allocation8]  }
  0x3c   :  { %s696_s12 = sshll.u32 %s958_s11, 4  ;;  %s697_s12 = int_to_ptr.vmem [resolvable:$true] %s696_s12 }
  0x3d   :  { %760 = vmatmul.mubr.msk.bf16.vlgmr.msra.gmra.mrb[0].mxu0 %vm63_vm2, %v1026_v3  ;;  %s921_s13 = scalar_lea.vmem %s697_s12, 512  ;;  %p926_p11 = scmp.lt.s32.totalorder %s697_s12, %s697_s12 }
  0x3e   :  { %773 = vmatprep.mubr.msk.bf16.mxu0 %vm955_vm0, %v954_v0  ;;  %770 = vmatpush3.bf16.msra.mxu0 %v838_v11  ;;  %p922_p10 = scmp.ne.s32.totalorder %s697_s12, %s921_s13  ;;  %p927_p12 = scmp.lt.s32.totalorder %s921_s13, %s921_s13 }
  0x3f   :  { %771 = vmatprep.subr.bf16.mxu0 %v954_v0 }
  0x40   :  { %p928_p13 = por %p927_p12, %p926_p11 }
  0x42   :  { %772 = vmatpush3.bf16.msra.mxu0 %v839_v12  ;;  %p929_p0 = pnand %p928_p13, %p922_p10 }
  0x43   :  { %783 = vmatprep.subr.bf16.mxu0 %v954_v0 }
  0xad   :  { %v411_v57 = vpop.permute.xlu0 %410 }
 0x110   :  { %v105_v6 = vpop.f32.mrb[0].mxu0 }
 0x111   :  { %v111_v7 = vpack.c.bf16 %v105_v6, %v105_v6  ;;  %v761_v8 = vpop.f32.mrb[1].mxu0 }
 0x112   :  { %v108_v9 = vpop.f32.mrb[2].mxu0 }
 0x113   :  { %v762_v10 = vpop.f32.mrb[3].mxu0  ;;  %766 = vmatmul.mubr.msk.bf16.vlgmr.msra.gmra.mrb[0].mxu1 %vm124_vm3, %v111_v7 }
 0x114   :  { %779 = vmatprep.mubr.msk.bf16.mxu1 %vm955_vm0, %v954_v0 }
 0x1e6   :  { %v162_v14 = vpop.f32.mrb[0].mxu1 }
 0x1e7   :  { %v163_v15 = vadd.f32 %v707_v13, %v162_v14  ;;  %v767_v16 = vpop.f32.mrb[1].mxu1 }
 0x1e8   :  { %v165_v17 = vpop.f32.mrb[2].mxu1 }
 0x1e9   :  { %v168_v18 = vmax.f32 %v163_v15, 0.0  ;;  %v768_v19 = vpop.f32.mrb[3].mxu1 }
 0x1ea   :  { %v844_v19 = vld [vmem:[#allocation7 + $0x44] ss:$24 sps:$4 sm:$0xff]  }
 0x1eb   :  { %v174_v20 = vpack.c.bf16 %v168_v18, %v168_v18  ;;  %v843_v18 = vld [vmem:[#allocation7 + $0x14] ss:$24 sps:$4 sm:$0xff]  }
 0x1ed   :  { %774 = vmatmul.mubr.msk.bf16.vlgmr.msra.gmra.mrb[4].mxu0 %vm187_vm4, %v174_v20  ;;  %v725_v20 = vld [vmem:[%s1114_s3 + $0x4] ss:$0 sm:$0xff] }
 0x1ee   :  { %785 = vmatprep.mubr.msk.bf16.mxu0 %vm955_vm0, %v954_v0  ;;  %784 = vmatpush3.bf16.msra.mxu0 %v840_v27 }
 0x1ef   :  { %795 = vmatprep.subr.bf16.mxu0 %v954_v0 }
 0x2c0   :  { %v225_v21 = vpop.f32.mrb[4].mxu0 }
 0x2c1   :  { %v231_v22 = vpack.c.bf16 %v225_v21, %v225_v21  ;;  %v775_v23 = vpop.f32.mrb[5].mxu0 }
 0x2c2   :  { %v228_v24 = vpop.f32.mrb[6].mxu0 }
 0x2c3   :  { %v239_v25 = vsel %vm67_vm1, %v231_v22, 0  ;;  %v776_v26 = vpop.f32.mrb[7].mxu0 }
 0x2c4   :  { %778 = vmatpush3.bf16.msra.mxu1 %v239_v25 }
 0x2c5   :  { %789 = vmatprep.subr.bf16.mxu1 %v954_v0 }
 0x2c7   :  { %780 = vmatmul.mubr.msk.bf16.vlgmr.msra.gmra.mrb[4].mxu1 %vm63_vm2, %v1026_v3 }
 0x2c8   :  { %791 = vmatprep.mubr.msk.bf16.mxu1 %vm955_vm0, %v954_v0  ;;  %790 = vmatpush3.bf16.msra.mxu1 %v841_v36 }
 0x2c9   :  { %801 = vmatprep.subr.bf16.mxu1 %v954_v0 }
 0x39a   :  { %v275_v29 = vpop.f32.mrb[4].mxu1 }
 0x39b   :  { %v276_v30 = vadd.f32 %v713_v28, %v275_v29  ;;  %v781_v31 = vpop.f32.mrb[5].mxu1 }
 0x39c   :  { %v278_v32 = vpop.f32.mrb[6].mxu1 }
 0x39d   :  { %v281_v33 = vmax.f32 %v276_v30, 0.0  ;;  %v782_v34 = vpop.f32.mrb[7].mxu1 }
 0x39f   :  { %v284_v35 = vpack.c.bf16 %v281_v33, %v281_v33  ;;  %v731_v33 = vld [vmem:[%s1114_s3 + $0x5] ss:$0 sm:$0xff] }
 0x3a1   :  { %786 = vmatmul.mubr.msk.bf16.vlgmr.msra.gmra.mrb[8].mxu0 %vm124_vm3, %v284_v35 }
 0x3a2   :  { %797 = vmatprep.mubr.msk.bf16.mxu0 %vm955_vm0, %v954_v0 }
 0x474   :  { %v335_v39 = vpop.f32.mrb[8].mxu0 }
 0x475   :  { %v336_v40 = vadd.f32 %v715_v38, %v335_v39  ;;  %v787_v41 = vpop.f32.mrb[9].mxu0 }
 0x476   :  { %v338_v42 = vpop.f32.mrb[10].mxu0 }
 0x477   :  { %v718_v43 = vmul.f32 -1.442695, %v336_v40  ;;  %v788_v44 = vpop.f32.mrb[11].mxu0 }
 0x479   :  { %845 = vpow2.f32 %v718_v43 }
 0x483   :  { %v846_v45 = vpop.eup %845 }
 0x484   :  { %v344_v46 = vadd.f32 1.0, %v846_v45 }
 0x486   :  { %847 = vrcp.f32 %v344_v46 }
 0x490   :  { %v848_v47 = vpop.eup %847 }
 0x491   :  { %v349_v48 = vpack.c.bf16 %v848_v47, %v848_v47 }
 0x493   :  { %792 = vmatmul.mubr.msk.bf16.vlgmr.msra.gmra.mrb[8].mxu1 %vm124_vm3, %v349_v48 }
 0x494   :  { %803 = vmatprep.mubr.msk.bf16.mxu1 %vm955_vm0, %v954_v0 }
 0x566   :  { %v400_v50 = vpop.f32.mrb[8].mxu1 }
 0x567   :  { %v401_v51 = vadd.f32 %v719_v49, %v400_v50  ;;  %v793_v52 = vpop.f32.mrb[9].mxu1 }
 0x568   :  { %v403_v53 = vpop.f32.mrb[10].mxu1 }
 0x569   :  { %v406_v54 = vmul.f32 0.5, %v401_v51  ;;  %684 = vst.msk [vmem:[#allocation8 + $0x10] sm:$0xff] %vm124_vm3, %v401_v51  ;;  %686 = vrot.lane.b32.xlu1 %v401_v51, %s957_s7  ;;  %v794_v55 = vpop.f32.mrb[11].mxu1 }
 0x56b   :  { %v407_v56 = vmul.f32 1.442695, %v406_v54 }
 0x56d   :  { %849 = vpow2.f32 %v407_v56 }
 0x577   :  { %v850_v58 = vpop.eup %849 }
 0x578   :  { %v413_v59 = vmul.f32 %v850_v58, %v411_v57 }
 0x57a   :  { %415 = vrot.lane.b32.xlu0 %v413_v59, %s957_s7 }
 0x5db   :  { %v687_v60 = vpop.permute.xlu1 %686 }
 0x5dc   :  { %689 = vst.msk [vmem:[#allocation8 + $0x18] sm:$0xff] %vm124_vm3, %v687_v60 }
 0x5ec   :  { %v416_v61 = vpop.permute.xlu0 %415 }
 0x5ed   :  { %v418_v62 = vadd.f32 %v416_v61, %v401_v51 }
 0x5ef   :  { %v419_v63 = vpack.c.bf16 %v418_v62, %v418_v62 }
 0x5f1   :  { %v421_v1 = vsel %vm124_vm3, %v419_v63, 0  ;;  %v473_v2 = vsel %vm67_vm1, %v419_v63, 0 }
 0x5f2   :  { %796 = vmatpush3.bf16.xpose.msra.mxu0 %v421_v1  ;;  %802 = vmatpush3.bf16.msra.mxu1 %v473_v2 }
 0x5f3   :  { %807 = vmatprep.subr.bf16.mxu0 %v954_v0  ;;  %813 = vmatprep.subr.bf16.mxu1 %v954_v0 }
 0x5f5   :  { %804 = vmatmul.mubr.msk.bf16.vlgmr.msra.gmra.mrb[12].mxu1 %vm63_vm2, %v1026_v3 }
 0x5f6   :  { %817 = vmatprep.mubr.msk.bf16.mxu1 %vm955_vm0, %v954_v0  ;;  %814 = vmatpush3.bf16.msra.mxu1 %v843_v18 }
 0x5f7   :  { %815 = vmatprep.subr.bf16.mxu1 %v954_v0 }
 0x5f9   :  { %798 = vmatmul.mubr.msk.bf16.vlgmr.msra.gmra.mrb[12].mxu0 %vm124_vm3, %v419_v63 }
 0x5fa   :  { %809 = vmatprep.mubr.msk.bf16.mxu0 %vm955_vm0, %v954_v0  ;;  %808 = vmatpush3.bf16.msra.mxu0 %v842_v4 }
 0x5fb   :  { %821 = vmatprep.subr.bf16.mxu0 %v954_v0  ;;  %816 = vmatpush3.bf16.msra.mxu1 %v844_v19 }
 0x6c8   :  { %v509_v5 = vpop.f32.mrb[12].mxu1 }
 0x6c9   :  { %v515_v6 = vpack.c.bf16 %v509_v5, %v509_v5  ;;  %v805_v7 = vpop.f32.mrb[13].mxu1 }
 0x6ca   :  { %v512_v8 = vpop.f32.mrb[14].mxu1 }
 0x6cb   :  { %v806_v9 = vpop.f32.mrb[15].mxu1  ;;  %810 = vmatmul.mubr.msk.bf16.vlgmr.msra.gmra.mrb[16].mxu0 %vm124_vm3, %v515_v6 }
 0x6cc   :  { %v457_v10 = vpop.f32.mrb[12].mxu0  ;;  %823 = vmatprep.mubr.msk.bf16.mxu0 %vm955_vm0, %v954_v0 }
 0x6cd   :  { %v723_v11 = vmul.f32 -1.442695, %v457_v10  ;;  %v799_v12 = vpop.f32.mrb[13].mxu0 }
 0x6ce   :  { %v460_v13 = vpop.f32.mrb[14].mxu0 }
 0x6cf   :  { %851 = vpow2.f32 %v723_v11  ;;  %v800_v14 = vpop.f32.mrb[15].mxu0 }
 0x6d9   :  { %v852_v15 = vpop.eup %851 }
 0x6da   :  { %v466_v16 = vadd.f32 1.0, %v852_v15 }
 0x6dc   :  { %853 = vrcp.f32 %v466_v16 }
 0x6e6   :  { %v854_v17 = vpop.eup %853 }
 0x6e7   :  { %469 = vst.msk [vmem:[#allocation8] sm:$0xff] %vm63_vm2, %v854_v17 }
 0x79e   :  { %v565_v21 = vpop.f32.mrb[16].mxu0 }
 0x79f   :  { %v566_v22 = vadd.f32 %v725_v20, %v565_v21  ;;  %v811_v23 = vpop.f32.mrb[17].mxu0 }
 0x7a0   :  { %v568_v24 = vpop.f32.mrb[18].mxu0 }
 0x7a1   :  { %v571_v25 = vmax.f32 %v566_v22, 0.0  ;;  %v812_v26 = vpop.f32.mrb[19].mxu0 }
 0x7a3   :  { %v577_v27 = vpack.c.bf16 %v571_v25, %v571_v25 }
 0x7a5   :  { %818 = vmatmul.mubr.msk.bf16.vlgmr.msra.gmra.mrb[16].mxu1 %vm187_vm4, %v577_v27 }
 0x878   :  { %v627_v28 = vpop.f32.mrb[16].mxu1 }
 0x879   :  { %v633_v29 = vpack.c.bf16 %v627_v28, %v627_v28  ;;  %v819_v30 = vpop.f32.mrb[17].mxu1 }
 0x87a   :  { %v630_v31 = vpop.f32.mrb[18].mxu1 }
 0x87b   :  { %v641_v0 = vsel %vm67_vm1, %v633_v29, 0  ;;  %v820_v32 = vpop.f32.mrb[19].mxu1 }
 0x87c   :  { %822 = vmatpush3.bf16.msra.mxu0 %v641_v0 }
 0x87f   :  { %824 = vmatmul.mubr.msk.bf16.vlgmr.msra.gmra.mrb[20].mxu0 %vm63_vm2, %v1026_v3 }
 0x952   :  { %v677_v34 = vpop.f32.mrb[20].mxu0 }
 0x953   :  { %v678_v35 = vadd.f32 %v731_v33, %v677_v34  ;;  %v825_v36 = vpop.f32.mrb[21].mxu0 }
 0x954   :  { %v680_v37 = vpop.f32.mrb[22].mxu0 }
 0x955   :  { %683 = vst.msk [vmem:[#allocation8 + $0x8] sm:$0xff] %vm124_vm3, %v678_v35  ;;  %v826_v38 = vpop.f32.mrb[23].mxu0 }
 0x956   :  { %932 = shalt.err (!%p929_p0)
}
 0x957   :  { %s933_s3 = scalar_lea.hbm %s1115_s4, 512 }
 0x958   :  { %p934_p1 = scmp.ne.s32.totalorder %s1115_s4, %s933_s3  ;;  %p937_p2 = scmp.lt.u32.totalorder %s933_s3, %s1115_s4 }
 0x95a   :  { %p939_p3 = pnand %p937_p2, %p934_p1 }
 0x95c   :  { %942 = shalt.err (!%p939_p3)
}
 0x95d   :  { %699 = dma.vmem_to_hbm [thread:$0]  %s697_s12, 512, %s1115_s4, [#allocation4]  }
 0x95e   :  { %947 = dma.done.wait [#allocation4], 512  }
 0x95f   :  { %948 = vsyncadd [#allocation4], 4294966784 }
 0x960   :  { %703 = vsyncpa [#allocation3], 1 }
 0x961   :  { %704 = vsyncpa [#allocation6], 1 }
 0x962   :  { %705 = vsyncpa [#allocation4], 1 }

</bundles_post_ra>
